<compile_context>
chip_gen: v5e
topology: v5e:2x2
jax: 0.10.0
libtpu: 0.0.40
codegen_flags: <defaults>
</compile_context>

<pallas_src>
import functools

import jax
import jax.numpy as jnp
from jax.experimental import pallas as pl
from jax.experimental.pallas import tpu as pltpu


# ----------------------------------------------------------------------------
# Kernels
# ----------------------------------------------------------------------------
def _gcn_conv_kernel(a_ref, x_ref, w_ref, b_ref, o_ref, acc_ref, *, tile_k):
    """One GCNConv layer:  o = relu((A @ X) @ W + b), tiled over rows of A.

    grid = (row_tiles, reduction_tiles).  X is VMEM-resident (full array) and
    sliced per reduction step; acc accumulates A[i,k] @ X[k] in f32; the
    bf16 x bf16 projection + bias + relu epilogue runs on the last k step only.
    """
    k = pl.program_id(1)

    @pl.when(k == 0)
    def _():
        acc_ref[...] = jnp.zeros_like(acc_ref)

    start = pl.multiple_of(k * tile_k, tile_k)
    x_blk = x_ref[pl.ds(start, tile_k), :]            # resident X, no re-stream
    acc_ref[...] += jnp.dot(a_ref[...], x_blk,
                            preferred_element_type=jnp.float32)

    @pl.when(k == pl.num_programs(1) - 1)
    def _():
        h = jnp.dot(acc_ref[...].astype(jnp.bfloat16), w_ref[...],
                    preferred_element_type=jnp.float32)
        h = jnp.maximum(h + b_ref[...], 0.0)          # bias + relu in f32 (VPU)
        o_ref[...] = h.astype(o_ref.dtype)            # bf16 out for next layer


def _gcn_conv_pool_kernel(a_ref, x_ref, w_ref, b_ref, p_ref, w3_ref, b3_ref,
                          o_ref, acc_ref, pool_ref, *, tile_k):
    """Layer 2 fused with global_mean_pool and the final Linear:

        h2_tile = relu((A @ h1)[row_tile] @ W2 + b2)      (per row tile)
        pool   += P[:, row_tile] @ h2_tile                (f32 accumulator)
        out     = pool @ W3 + b3                          (last grid step)

    h2 never round-trips HBM.  Both grid axes must be 'arbitrary' because the
    pooled accumulator crosses row tiles.
    """
    i = pl.program_id(0)
    k = pl.program_id(1)

    @pl.when(jnp.logical_and(i == 0, k == 0))
    def _():
        pool_ref[...] = jnp.zeros_like(pool_ref)

    @pl.when(k == 0)
    def _():
        acc_ref[...] = jnp.zeros_like(acc_ref)

    start = pl.multiple_of(k * tile_k, tile_k)
    x_blk = x_ref[pl.ds(start, tile_k), :]            # resident h1
    acc_ref[...] += jnp.dot(a_ref[...], x_blk,
                            preferred_element_type=jnp.float32)

    last_k = k == pl.num_programs(1) - 1

    @pl.when(last_k)
    def _():
        h = jnp.dot(acc_ref[...].astype(jnp.bfloat16), w_ref[...],
                    preferred_element_type=jnp.float32)
        h = jnp.maximum(h + b_ref[...], 0.0)          # f32 h2 row tile
        # mean-pool contribution of this row tile, kept fully in f32
        pool_ref[...] += jnp.dot(p_ref[...], h,
                                 preferred_element_type=jnp.float32)

    @pl.when(jnp.logical_and(last_k, i == pl.num_programs(0) - 1))
    def _():
        o_ref[...] = (jnp.dot(pool_ref[...].astype(jnp.bfloat16), w3_ref[...],
                              preferred_element_type=jnp.float32)
                      + b3_ref[...])


# ----------------------------------------------------------------------------
# pallas_call wrappers
# ----------------------------------------------------------------------------
def _round_up(x, m):
    return ((x + m - 1) // m) * m


def _pad2(x, rows, cols):
    return jnp.pad(x, ((0, rows - x.shape[0]), (0, cols - x.shape[1])))


def _gcn_conv_layer(a, x, w, b, *, tile_m, tile_k, vmem_limit):
    n_pad = a.shape[0]
    f_in = x.shape[1]
    f_out = w.shape[1]
    grid = (n_pad // tile_m, n_pad // tile_k)          # reduction axis last
    kernel = functools.partial(_gcn_conv_kernel, tile_k=tile_k)
    return pl.pallas_call(
        kernel,
        out_shape=jax.ShapeDtypeStruct((n_pad, f_out), jnp.bfloat16),
        grid_spec=pltpu.PrefetchScalarGridSpec(
            num_scalar_prefetch=0,
            grid=grid,
            in_specs=[
                pl.BlockSpec((tile_m, tile_k), lambda i, k: (i, k)),   # A tile
                pl.BlockSpec((n_pad, f_in), lambda i, k: (0, 0)),      # X resident
                pl.BlockSpec((f_in, f_out), lambda i, k: (0, 0)),      # W (bf16)
                pl.BlockSpec((1, f_out), lambda i, k: (0, 0)),         # bias (f32)
            ],
            out_specs=pl.BlockSpec((tile_m, f_out), lambda i, k: (i, 0)),
            scratch_shapes=[pltpu.VMEM((tile_m, f_in), jnp.float32)],
        ),
        compiler_params=pltpu.CompilerParams(
            dimension_semantics=("parallel", "arbitrary"),
            vmem_limit_bytes=vmem_limit),
    )(a, x, w, b)


def _gcn_conv_pool_layer(a, x, w2, b2, p, w3, b3, *, tile_m, tile_k,
                         vmem_limit):
    n_pad = a.shape[0]
    f_in = x.shape[1]
    f_hid = w2.shape[1]
    g_pad = p.shape[0]
    f_out = w3.shape[1]
    grid = (n_pad // tile_m, n_pad // tile_k)
    kernel = functools.partial(_gcn_conv_pool_kernel, tile_k=tile_k)
    return pl.pallas_call(
        kernel,
        out_shape=jax.ShapeDtypeStruct((g_pad, f_out), jnp.float32),
        grid_spec=pltpu.PrefetchScalarGridSpec(
            num_scalar_prefetch=0,
            grid=grid,
            in_specs=[
                pl.BlockSpec((tile_m, tile_k), lambda i, k: (i, k)),   # A tile
                pl.BlockSpec((n_pad, f_in), lambda i, k: (0, 0)),      # h1 resident
                pl.BlockSpec((f_in, f_hid), lambda i, k: (0, 0)),      # W2 (bf16)
                pl.BlockSpec((1, f_hid), lambda i, k: (0, 0)),         # b2 (f32)
                pl.BlockSpec((g_pad, tile_m), lambda i, k: (0, i)),    # P row tile (f32)
                pl.BlockSpec((f_hid, f_out), lambda i, k: (0, 0)),     # W3 (bf16)
                pl.BlockSpec((1, f_out), lambda i, k: (0, 0)),         # b3 (f32)
            ],
            out_specs=pl.BlockSpec((g_pad, f_out), lambda i, k: (0, 0)),
            scratch_shapes=[pltpu.VMEM((tile_m, f_hid), jnp.float32),
                            pltpu.VMEM((g_pad, f_hid), jnp.float32)],
        ),
        compiler_params=pltpu.CompilerParams(
            # Row axis must stay 'arbitrary': the pooled accumulator crosses
            # row tiles (a 'parallel' split would need a cross-core combine).
            dimension_semantics=("arbitrary", "arbitrary"),
            vmem_limit_bytes=vmem_limit),
    )(a, x, w2, b2, p, w3, b3)


@functools.partial(jax.jit, static_argnames=("num_graphs", "tile"))
def gcn_forward(x, a_hat, pool, w1, b1, w2, b2, w3, b3, *, num_graphs,
                tile=512):
    """Full GCNModule forward.  Pads to lane/tile-dense shapes, runs the two
    fused Pallas stages, and slices the real (num_graphs, out_dim) result."""
    n, in_dim = x.shape
    hidden = w1.shape[1]
    out_dim = w3.shape[1]

    lane = 128
    # --- adaptive tiling (don't pad an 8-node graph to 512x512 of zeros) ----
    tile_k = min(tile, _round_up(n, lane))
    n_pad = _round_up(n, tile_k)
    if n_pad // tile_k < 2 and n_pad >= 2 * lane:
        tile_m = n_pad // 2          # keep >=2 row tiles for v7x megacore
    else:
        tile_m = tile_k

    in_pad = _round_up(in_dim, lane)
    hid_pad = _round_up(hidden, lane)
    out_pad = _round_up(out_dim, lane)
    g_pad = _round_up(num_graphs, 8)

    # Zero padding is exact: padded rows/cols of A and P are zero, so padded
    # nodes never contribute to real nodes or to the pooled graph embeddings.
    a_p = _pad2(a_hat, n_pad, n_pad).astype(jnp.bfloat16)
    x_p = _pad2(x, n_pad, in_pad).astype(jnp.bfloat16)
    p_p = _pad2(pool, g_pad, n_pad).astype(jnp.float32)   # pool kept in f32

    w1_p = _pad2(w1, in_pad, hid_pad).astype(jnp.bfloat16)
    w2_p = _pad2(w2, hid_pad, hid_pad).astype(jnp.bfloat16)
    w3_p = _pad2(w3, hid_pad, out_pad).astype(jnp.bfloat16)
    b1_p = _pad2(b1, 1, hid_pad).astype(jnp.float32)
    b2_p = _pad2(b2, 1, hid_pad).astype(jnp.float32)
    b3_p = _pad2(b3, 1, out_pad).astype(jnp.float32)

    # --- explicit VMEM budget (with headroom) so residency is accepted ------
    def conv_vmem(f_i, f_o, with_pool):
        bf, f32b = 2, 4
        byt = 2 * tile_m * tile_k * bf          # A tile, double-buffered
        byt += 2 * n_pad * f_i * bf             # resident X / h1
        byt += 2 * f_i * f_o * bf + 2 * f_o * f32b
        byt += tile_m * f_i * f32b              # f32 accumulator
        if with_pool:
            byt += 2 * g_pad * tile_m * f32b    # P row tile
            byt += g_pad * f_i * f32b           # pooled accumulator
            byt += 2 * f_i * out_pad * bf + 2 * out_pad * f32b
            byt += 2 * g_pad * out_pad * f32b   # output
        else:
            byt += 2 * tile_m * f_o * bf        # output tile
        return byt

    def vmem_limit(est):
        return int(min(max(2 * est, 32 * 2**20), 96 * 2**20))

    h1 = _gcn_conv_layer(
        a_p, x_p, w1_p, b1_p, tile_m=tile_m, tile_k=tile_k,
        vmem_limit=vmem_limit(conv_vmem(in_pad, hid_pad, False)))
    out = _gcn_conv_pool_layer(
        a_p, h1, w2_p, b2_p, p_p, w3_p, b3_p, tile_m=tile_m, tile_k=tile_k,
        vmem_limit=vmem_limit(conv_vmem(hid_pad, hid_pad, True)))
    return out[:num_graphs, :out_dim]


# ----------------------------------------------------------------------------
# Glue: normalized adjacency (with self loops) and mean-pool matrix in JAX.
# ----------------------------------------------------------------------------
def build_norm_adj(edge_index, num_nodes):
    src, dst = edge_index[0], edge_index[1]
    loop = jnp.arange(num_nodes, dtype=edge_index.dtype)
    src = jnp.concatenate([src, loop])
    dst = jnp.concatenate([dst, loop])
    # degree counted at the target node (matches degree(target, ...))
    deg = jnp.zeros((num_nodes,), jnp.float32).at[dst].add(1.0)
    dinv = jnp.where(deg > 0, deg ** -0.5, 0.0)
    norm = dinv[src] * dinv[dst]
    # out[target] += norm * x[source]  ==>  A[target, source] += norm
    # NOTE: duplicate edges sum, matching PyG only for deduplicated edge_index.
    return jnp.zeros((num_nodes, num_nodes), jnp.float32).at[dst, src].add(norm)


def build_mean_pool(batch, num_graphs, num_nodes):
    onehot = (batch[None, :] == jnp.arange(num_graphs)[:, None]).astype(
        jnp.float32)
    counts = jnp.maximum(onehot.sum(axis=1, keepdims=True), 1.0)
    return onehot / counts                         # [G, N]


# ----------------------------------------------------------------------------
# Main
# ----------------------------------------------------------------------------
if __name__ == "__main__":
    key = jax.random.PRNGKey(0)
    kx, k1, k2, k3, kb3 = jax.random.split(key, 5)

    # small shapes: 8 nodes, 2 graphs, in_dim=4, hidden=32, out_dim=3
    N, in_dim, hidden_dim, out_dim, G = 8, 4, 32, 3, 2

    x = jax.random.normal(kx, (N, in_dim), jnp.float32)

    # directed edges within each graph of 4 nodes
    edge_index = jnp.array(
        [[0, 1, 1, 2, 3, 4, 5, 5, 6, 7],
         [1, 0, 2, 3, 0, 5, 4, 6, 7, 4]], dtype=jnp.int32)
    batch = jnp.array([0, 0, 0, 0, 1, 1, 1, 1], dtype=jnp.int32)

    # GCNConv.lin has no bias; GCNConv.bias is zero-initialized.
    w1 = jax.random.normal(k1, (in_dim, hidden_dim), jnp.float32) * 0.2
    b1 = jnp.zeros((1, hidden_dim), jnp.float32)
    w2 = jax.random.normal(k2, (hidden_dim, hidden_dim), jnp.float32) * 0.1
    b2 = jnp.zeros((1, hidden_dim), jnp.float32)
    # final nn.Linear(hidden_dim, out_dim) with bias
    w3 = jax.random.normal(k3, (hidden_dim, out_dim), jnp.float32) * 0.1
    b3 = jax.random.normal(kb3, (1, out_dim), jnp.float32) * 0.05

    a_hat = build_norm_adj(edge_index, N)
    pool = build_mean_pool(batch, G, N)

    out = gcn_forward(x, a_hat, pool, w1, b1, w2, b2, w3, b3,
                      num_graphs=G, tile=512)
    out = jax.block_until_ready(out)

    # f32 reference of the original module's math (outside Pallas)
    h = jnp.maximum(a_hat @ (x @ w1) + b1, 0.0)
    h = jnp.maximum(a_hat @ (h @ w2) + b2, 0.0)
    ref = pool @ h @ w3 + b3

    assert out.shape == (G, out_dim)
    # bf16 streamed operands with f32 accumulation -> slightly looser tolerance
    assert jnp.allclose(out, ref, atol=2e-2, rtol=2e-2), float(
        jnp.max(jnp.abs(out - ref)))

    print("KERNEL_OK")
</pallas_src>

<mosaic_0001>
module attributes {stable_mosaic.version = 11 : i64} {
  func.func @_gcn_conv_kernel(%arg0: i32, %arg1: i32, %arg2: memref<128x128xbf16, #tpu.memory_space<vmem>>, %arg3: memref<128x128xbf16, #tpu.memory_space<vmem>>, %arg4: memref<128x128xbf16, #tpu.memory_space<vmem>>, %arg5: memref<1x128xf32, #tpu.memory_space<vmem>>, %arg6: memref<128x128xbf16, #tpu.memory_space<vmem>>, %arg7: memref<128x128xf32, #tpu.memory_space<vmem>>) attributes {dimension_semantics = [#tpu.dimension_semantics<parallel>, #tpu.dimension_semantics<arbitrary>], iteration_bounds = array<i64: 1, 1>, scalar_prefetch = 0 : i64, scratch_operands = 1 : i64, tpu.core_type = #tpu.core_type<tc>, window_params = [{transform_indices = @transform_0, window_bounds = array<i64: 128, 128>}, {pipeline_mode = #tpu.pipeline_mode<synchronous>, transform_indices = @transform_1, window_bounds = array<i64: 128, 128>}, {pipeline_mode = #tpu.pipeline_mode<synchronous>, transform_indices = @transform_2, window_bounds = array<i64: 128, 128>}, {pipeline_mode = #tpu.pipeline_mode<synchronous>, transform_indices = @transform_3, window_bounds = array<i64: 1, 128>}, {transform_indices = @transform_4, window_bounds = array<i64: 128, 128>}]} {
    %c0_i32 = arith.constant 0 : i32
    %0 = arith.cmpi eq, %arg1, %c0_i32 : i32
    %1 = arith.extui %0 : i1 to i32
    %c0_i32_0 = arith.constant 0 : i32
    %2 = arith.cmpi ne, %1, %c0_i32_0 : i32
    scf.if %2 {
      %cst_9 = arith.constant 0.000000e+00 : f32
      %15 = vector.broadcast %cst_9 : f32 to vector<128x128xf32>
      %c0_10 = arith.constant 0 : index
      %c0_11 = arith.constant 0 : index
      %16 = vector.load %arg7[%c0_10, %c0_11] : memref<128x128xf32, #tpu.memory_space<vmem>>, vector<128x128xf32>
      tpu.vector_store %arg7[%c0_10, %c0_11], %15 {strides = array<i32>} : memref<128x128xf32, #tpu.memory_space<vmem>>, vector<128x128xf32>,
    } else {
    }
    %c128_i32 = arith.constant 128 : i32
    %3 = arith.muli %arg1, %c128_i32 : i32
    %4 = tpu.assume_multiple %3, 128 : i32
    %5 = arith.index_cast %4 : i32 to index
    %c0 = arith.constant 0 : index
    %6 = vector.load %arg3[%5, %c0] : memref<128x128xbf16, #tpu.memory_space<vmem>>, vector<128x128xbf16>
    %c0_1 = arith.constant 0 : index
    %c0_2 = arith.constant 0 : index
    %7 = vector.load %arg7[%c0_1, %c0_2] : memref<128x128xf32, #tpu.memory_space<vmem>>, vector<128x128xf32>
    %c0_3 = arith.constant 0 : index
    %c0_4 = arith.constant 0 : index
    %8 = vector.load %arg2[%c0_3, %c0_4] : memref<128x128xbf16, #tpu.memory_space<vmem>>, vector<128x128xbf16>
    %cst = arith.constant dense<0.000000e+00> : vector<128x128xf32>
    %9 = tpu.matmul %8, %6, %cst {dimension_numbers = #tpu.dot_dimension_numbers<[1], [0], [0], [1], [0, 0, 1, 1], [], []>} : vector<128x128xbf16>, vector<128x128xbf16>, vector<128x128xf32> -> vector<128x128xf32>
    %10 = arith.addf %7, %9 : vector<128x128xf32>
    %c0_5 = arith.constant 0 : index
    %c0_6 = arith.constant 0 : index
    %11 = vector.load %arg7[%c0_5, %c0_6] : memref<128x128xf32, #tpu.memory_space<vmem>>, vector<128x128xf32>
    tpu.vector_store %arg7[%c0_5, %c0_6], %10 {strides = array<i32>} : memref<128x128xf32, #tpu.memory_space<vmem>>, vector<128x128xf32>,
    %c0_i32_7 = arith.constant 0 : i32
    %12 = arith.cmpi eq, %arg1, %c0_i32_7 : i32
    %13 = arith.extui %12 : i1 to i32
    %c0_i32_8 = arith.constant 0 : i32
    %14 = arith.cmpi ne, %13, %c0_i32_8 : i32
    scf.if %14 {
      %c0_9 = arith.constant 0 : index
      %c0_10 = arith.constant 0 : index
      %15 = vector.load %arg7[%c0_9, %c0_10] : memref<128x128xf32, #tpu.memory_space<vmem>>, vector<128x128xf32>
      %16 = arith.truncf %15 : vector<128x128xf32> to vector<128x128xbf16>
      %c0_11 = arith.constant 0 : index
      %c0_12 = arith.constant 0 : index
      %17 = vector.load %arg4[%c0_11, %c0_12] : memref<128x128xbf16, #tpu.memory_space<vmem>>, vector<128x128xbf16>
      %cst_13 = arith.constant dense<0.000000e+00> : vector<128x128xf32>
      %18 = tpu.matmul %16, %17, %cst_13 {dimension_numbers = #tpu.dot_dimension_numbers<[1], [0], [0], [1], [0, 0, 1, 1], [], []>} : vector<128x128xbf16>, vector<128x128xbf16>, vector<128x128xf32> -> vector<128x128xf32>
      %c0_14 = arith.constant 0 : index
      %c0_15 = arith.constant 0 : index
      %19 = vector.load %arg5[%c0_14, %c0_15] : memref<1x128xf32, #tpu.memory_space<vmem>>, vector<1x128xf32>
      %20 = vector.broadcast %19 : vector<1x128xf32> to vector<128x128xf32>
      %21 = arith.addf %18, %20 : vector<128x128xf32>
      %cst_16 = arith.constant 0.000000e+00 : f32
      %22 = vector.broadcast %cst_16 : f32 to vector<128x128xf32>
      %23 = arith.maximumf %21, %22 : vector<128x128xf32>
      %24 = arith.truncf %23 : vector<128x128xf32> to vector<128x128xbf16>
      %c0_17 = arith.constant 0 : index
      %c0_18 = arith.constant 0 : index
      %25 = vector.load %arg6[%c0_17, %c0_18] : memref<128x128xbf16, #tpu.memory_space<vmem>>, vector<128x128xbf16>
      tpu.vector_store %arg6[%c0_17, %c0_18], %24 {strides = array<i32>} : memref<128x128xbf16, #tpu.memory_space<vmem>>, vector<128x128xbf16>,
    } else {
    }
    return
  }
  func.func @transform_0(%arg0: i32, %arg1: i32) -> (i32, i32) {
    %c0_i32 = arith.constant 0 : i32
    return %arg0, %arg1 : i32, i32
  }
  func.func @transform_1(%arg0: i32, %arg1: i32) -> (i32, i32) {
    %c0_i32 = arith.constant 0 : i32
    %c0_i32_0 = arith.constant 0 : i32
    %c0_i32_1 = arith.constant 0 : i32
    return %c0_i32, %c0_i32_0 : i32, i32
  }
  func.func @transform_2(%arg0: i32, %arg1: i32) -> (i32, i32) {
    %c0_i32 = arith.constant 0 : i32
    %c0_i32_0 = arith.constant 0 : i32
    %c0_i32_1 = arith.constant 0 : i32
    return %c0_i32, %c0_i32_0 : i32, i32
  }
  func.func @transform_3(%arg0: i32, %arg1: i32) -> (i32, i32) {
    %c0_i32 = arith.constant 0 : i32
    %c0_i32_0 = arith.constant 0 : i32
    %c0_i32_1 = arith.constant 0 : i32
    return %c0_i32, %c0_i32_0 : i32, i32
  }
  func.func @transform_4(%arg0: i32, %arg1: i32) -> (i32, i32) {
    %c0_i32 = arith.constant 0 : i32
    %c0_i32_0 = arith.constant 0 : i32
    return %arg0, %c0_i32 : i32, i32
  }
}

module attributes {stable_mosaic.version = 11 : i64} {
  func.func @_gcn_conv_pool_kernel(%arg0: i32, %arg1: i32, %arg2: memref<128x128xbf16, #tpu.memory_space<vmem>>, %arg3: memref<128x128xbf16, #tpu.memory_space<vmem>>, %arg4: memref<128x128xbf16, #tpu.memory_space<vmem>>, %arg5: memref<1x128xf32, #tpu.memory_space<vmem>>, %arg6: memref<8x128xf32, #tpu.memory_space<vmem>>, %arg7: memref<128x128xbf16, #tpu.memory_space<vmem>>, %arg8: memref<1x128xf32, #tpu.memory_space<vmem>>, %arg9: memref<8x128xf32, #tpu.memory_space<vmem>>, %arg10: memref<128x128xf32, #tpu.memory_space<vmem>>, %arg11: memref<8x128xf32, #tpu.memory_space<vmem>>) attributes {dimension_semantics = [#tpu.dimension_semantics<arbitrary>, #tpu.dimension_semantics<arbitrary>], iteration_bounds = array<i64: 1, 1>, scalar_prefetch = 0 : i64, scratch_operands = 2 : i64, tpu.core_type = #tpu.core_type<tc>, window_params = [{transform_indices = @transform_0, window_bounds = array<i64: 128, 128>}, {pipeline_mode = #tpu.pipeline_mode<synchronous>, transform_indices = @transform_1, window_bounds = array<i64: 128, 128>}, {pipeline_mode = #tpu.pipeline_mode<synchronous>, transform_indices = @transform_2, window_bounds = array<i64: 128, 128>}, {pipeline_mode = #tpu.pipeline_mode<synchronous>, transform_indices = @transform_3, window_bounds = array<i64: 1, 128>}, {transform_indices = @transform_4, window_bounds = array<i64: 8, 128>}, {pipeline_mode = #tpu.pipeline_mode<synchronous>, transform_indices = @transform_5, window_bounds = array<i64: 128, 128>}, {pipeline_mode = #tpu.pipeline_mode<synchronous>, transform_indices = @transform_6, window_bounds = array<i64: 1, 128>}, {pipeline_mode = #tpu.pipeline_mode<synchronous>, transform_indices = @transform_7, window_bounds = array<i64: 8, 128>}]} {
    %c0_i32 = arith.constant 0 : i32
    %0 = arith.cmpi eq, %arg0, %c0_i32 : i32
    %c0_i32_0 = arith.constant 0 : i32
    %1 = arith.cmpi eq, %arg1, %c0_i32_0 : i32
    %2 = arith.andi %0, %1 : i1
    %3 = arith.extui %2 : i1 to i32
    %c0_i32_1 = arith.constant 0 : i32
    %4 = arith.cmpi ne, %3, %c0_i32_1 : i32
    scf.if %4 {
      %cst_14 = arith.constant 0.000000e+00 : f32
      %24 = vector.broadcast %cst_14 : f32 to vector<8x128xf32>
      %c0_15 = arith.constant 0 : index
      %c0_16 = arith.constant 0 : index
      %25 = vector.load %arg11[%c0_15, %c0_16] : memref<8x128xf32, #tpu.memory_space<vmem>>, vector<8x128xf32>
      tpu.vector_store %arg11[%c0_15, %c0_16], %24 {strides = array<i32>} : memref<8x128xf32, #tpu.memory_space<vmem>>, vector<8x128xf32>,
    } else {
    }
    %c0_i32_2 = arith.constant 0 : i32
    %5 = arith.cmpi eq, %arg1, %c0_i32_2 : i32
    %6 = arith.extui %5 : i1 to i32
    %c0_i32_3 = arith.constant 0 : i32
    %7 = arith.cmpi ne, %6, %c0_i32_3 : i32
    scf.if %7 {
      %cst_14 = arith.constant 0.000000e+00 : f32
      %24 = vector.broadcast %cst_14 : f32 to vector<128x128xf32>
      %c0_15 = arith.constant 0 : index
      %c0_16 = arith.constant 0 : index
      %25 = vector.load %arg10[%c0_15, %c0_16] : memref<128x128xf32, #tpu.memory_space<vmem>>, vector<128x128xf32>
      tpu.vector_store %arg10[%c0_15, %c0_16], %24 {strides = array<i32>} : memref<128x128xf32, #tpu.memory_space<vmem>>, vector<128x128xf32>,
    } else {
    }
    %c128_i32 = arith.constant 128 : i32
    %8 = arith.muli %arg1, %c128_i32 : i32
    %9 = tpu.assume_multiple %8, 128 : i32
    %10 = arith.index_cast %9 : i32 to index
    %c0 = arith.constant 0 : index
    %11 = vector.load %arg3[%10, %c0] : memref<128x128xbf16, #tpu.memory_space<vmem>>, vector<128x128xbf16>
    %c0_4 = arith.constant 0 : index
    %c0_5 = arith.constant 0 : index
    %12 = vector.load %arg10[%c0_4, %c0_5] : memref<128x128xf32, #tpu.memory_space<vmem>>, vector<128x128xf32>
    %c0_6 = arith.constant 0 : index
    %c0_7 = arith.constant 0 : index
    %13 = vector.load %arg2[%c0_6, %c0_7] : memref<128x128xbf16, #tpu.memory_space<vmem>>, vector<128x128xbf16>
    %cst = arith.constant dense<0.000000e+00> : vector<128x128xf32>
    %14 = tpu.matmul %13, %11, %cst {dimension_numbers = #tpu.dot_dimension_numbers<[1], [0], [0], [1], [0, 0, 1, 1], [], []>} : vector<128x128xbf16>, vector<128x128xbf16>, vector<128x128xf32> -> vector<128x128xf32>
    %15 = arith.addf %12, %14 : vector<128x128xf32>
    %c0_8 = arith.constant 0 : index
    %c0_9 = arith.constant 0 : index
    %16 = vector.load %arg10[%c0_8, %c0_9] : memref<128x128xf32, #tpu.memory_space<vmem>>, vector<128x128xf32>
    tpu.vector_store %arg10[%c0_8, %c0_9], %15 {strides = array<i32>} : memref<128x128xf32, #tpu.memory_space<vmem>>, vector<128x128xf32>,
    %c0_i32_10 = arith.constant 0 : i32
    %17 = arith.cmpi eq, %arg1, %c0_i32_10 : i32
    %18 = arith.extui %17 : i1 to i32
    %c0_i32_11 = arith.constant 0 : i32
    %19 = arith.cmpi ne, %18, %c0_i32_11 : i32
    scf.if %19 {
      %c0_14 = arith.constant 0 : index
      %c0_15 = arith.constant 0 : index
      %24 = vector.load %arg10[%c0_14, %c0_15] : memref<128x128xf32, #tpu.memory_space<vmem>>, vector<128x128xf32>
      %25 = arith.truncf %24 : vector<128x128xf32> to vector<128x128xbf16>
      %c0_16 = arith.constant 0 : index
      %c0_17 = arith.constant 0 : index
      %26 = vector.load %arg4[%c0_16, %c0_17] : memref<128x128xbf16, #tpu.memory_space<vmem>>, vector<128x128xbf16>
      %cst_18 = arith.constant dense<0.000000e+00> : vector<128x128xf32>
      %27 = tpu.matmul %25, %26, %cst_18 {dimension_numbers = #tpu.dot_dimension_numbers<[1], [0], [0], [1], [0, 0, 1, 1], [], []>} : vector<128x128xbf16>, vector<128x128xbf16>, vector<128x128xf32> -> vector<128x128xf32>
      %c0_19 = arith.constant 0 : index
      %c0_20 = arith.constant 0 : index
      %28 = vector.load %arg5[%c0_19, %c0_20] : memref<1x128xf32, #tpu.memory_space<vmem>>, vector<1x128xf32>
      %29 = vector.broadcast %28 : vector<1x128xf32> to vector<128x128xf32>
      %30 = arith.addf %27, %29 : vector<128x128xf32>
      %cst_21 = arith.constant 0.000000e+00 : f32
      %31 = vector.broadcast %cst_21 : f32 to vector<128x128xf32>
      %32 = arith.maximumf %30, %31 : vector<128x128xf32>
      %c0_22 = arith.constant 0 : index
      %c0_23 = arith.constant 0 : index
      %33 = vector.load %arg11[%c0_22, %c0_23] : memref<8x128xf32, #tpu.memory_space<vmem>>, vector<8x128xf32>
      %c0_24 = arith.constant 0 : index
      %c0_25 = arith.constant 0 : index
      %34 = vector.load %arg6[%c0_24, %c0_25] : memref<8x128xf32, #tpu.memory_space<vmem>>, vector<8x128xf32>
      %cst_26 = arith.constant dense<0.000000e+00> : vector<8x128xf32>
      %35 = tpu.matmul %34, %32, %cst_26 {dimension_numbers = #tpu.dot_dimension_numbers<[1], [0], [0], [1], [0, 0, 1, 1], [], []>} : vector<8x128xf32>, vector<128x128xf32>, vector<8x128xf32> -> vector<8x128xf32>
      %36 = arith.addf %33, %35 : vector<8x128xf32>
      %c0_27 = arith.constant 0 : index
      %c0_28 = arith.constant 0 : index
      %37 = vector.load %arg11[%c0_27, %c0_28] : memref<8x128xf32, #tpu.memory_space<vmem>>, vector<8x128xf32>
      tpu.vector_store %arg11[%c0_27, %c0_28], %36 {strides = array<i32>} : memref<8x128xf32, #tpu.memory_space<vmem>>, vector<8x128xf32>,
    } else {
    }
    %c0_i32_12 = arith.constant 0 : i32
    %20 = arith.cmpi eq, %arg0, %c0_i32_12 : i32
    %21 = arith.andi %17, %20 : i1
    %22 = arith.extui %21 : i1 to i32
    %c0_i32_13 = arith.constant 0 : i32
    %23 = arith.cmpi ne, %22, %c0_i32_13 : i32
    scf.if %23 {
      %c0_14 = arith.constant 0 : index
      %c0_15 = arith.constant 0 : index
      %24 = vector.load %arg11[%c0_14, %c0_15] : memref<8x128xf32, #tpu.memory_space<vmem>>, vector<8x128xf32>
      %25 = arith.truncf %24 : vector<8x128xf32> to vector<8x128xbf16>
      %c0_16 = arith.constant 0 : index
      %c0_17 = arith.constant 0 : index
      %26 = vector.load %arg7[%c0_16, %c0_17] : memref<128x128xbf16, #tpu.memory_space<vmem>>, vector<128x128xbf16>
      %cst_18 = arith.constant dense<0.000000e+00> : vector<8x128xf32>
      %27 = tpu.matmul %25, %26, %cst_18 {dimension_numbers = #tpu.dot_dimension_numbers<[1], [0], [0], [1], [0, 0, 1, 1], [], []>} : vector<8x128xbf16>, vector<128x128xbf16>, vector<8x128xf32> -> vector<8x128xf32>
      %c0_19 = arith.constant 0 : index
      %c0_20 = arith.constant 0 : index
      %28 = vector.load %arg8[%c0_19, %c0_20] : memref<1x128xf32, #tpu.memory_space<vmem>>, vector<1x128xf32>
      %29 = vector.broadcast %28 : vector<1x128xf32> to vector<8x128xf32>
      %30 = arith.addf %27, %29 : vector<8x128xf32>
      %c0_21 = arith.constant 0 : index
      %c0_22 = arith.constant 0 : index
      %31 = vector.load %arg9[%c0_21, %c0_22] : memref<8x128xf32, #tpu.memory_space<vmem>>, vector<8x128xf32>
      tpu.vector_store %arg9[%c0_21, %c0_22], %30 {strides = array<i32>} : memref<8x128xf32, #tpu.memory_space<vmem>>, vector<8x128xf32>,
    } else {
    }
    return
  }
  func.func @transform_0(%arg0: i32, %arg1: i32) -> (i32, i32) {
    %c0_i32 = arith.constant 0 : i32
    return %arg0, %arg1 : i32, i32
  }
  func.func @transform_1(%arg0: i32, %arg1: i32) -> (i32, i32) {
    %c0_i32 = arith.constant 0 : i32
    %c0_i32_0 = arith.constant 0 : i32
    %c0_i32_1 = arith.constant 0 : i32
    return %c0_i32, %c0_i32_0 : i32, i32
  }
  func.func @transform_2(%arg0: i32, %arg1: i32) -> (i32, i32) {
    %c0_i32 = arith.constant 0 : i32
    %c0_i32_0 = arith.constant 0 : i32
    %c0_i32_1 = arith.constant 0 : i32
    return %c0_i32, %c0_i32_0 : i32, i32
  }
  func.func @transform_3(%arg0: i32, %arg1: i32) -> (i32, i32) {
    %c0_i32 = arith.constant 0 : i32
    %c0_i32_0 = arith.constant 0 : i32
    %c0_i32_1 = arith.constant 0 : i32
    return %c0_i32, %c0_i32_0 : i32, i32
  }
  func.func @transform_4(%arg0: i32, %arg1: i32) -> (i32, i32) {
    %c0_i32 = arith.constant 0 : i32
    %c0_i32_0 = arith.constant 0 : i32
    return %c0_i32, %arg0 : i32, i32
  }
  func.func @transform_5(%arg0: i32, %arg1: i32) -> (i32, i32) {
    %c0_i32 = arith.constant 0 : i32
    %c0_i32_0 = arith.constant 0 : i32
    %c0_i32_1 = arith.constant 0 : i32
    return %c0_i32, %c0_i32_0 : i32, i32
  }
  func.func @transform_6(%arg0: i32, %arg1: i32) -> (i32, i32) {
    %c0_i32 = arith.constant 0 : i32
    %c0_i32_0 = arith.constant 0 : i32
    %c0_i32_1 = arith.constant 0 : i32
    return %c0_i32, %c0_i32_0 : i32, i32
  }
  func.func @transform_7(%arg0: i32, %arg1: i32) -> (i32, i32) {
    %c0_i32 = arith.constant 0 : i32
    %c0_i32_0 = arith.constant 0 : i32
    %c0_i32_1 = arith.constant 0 : i32
    return %c0_i32, %c0_i32_0 : i32, i32
  }
}

</mosaic_0001>

<bundles_post_ra>
// kernel: gcn_forward.2
= control target key start
LH: loop header
LB: loop body
LE: loop exit
PB: predicated region body
PF: predicated region fallthrough
CT: control target
= control target key end

     0   :  { %s773_s1 = inlined_call_operand.vmem [shape: bf16[128,128], index: 1, kind: input, shape index: {}]   ;;  %s774_s0 = inlined_call_operand.vmem [shape: bf16[128,128], index: 0, kind: input, shape index: {}]   ;;  %s775_s2 = inlined_call_operand.vmem [shape: bf16[128,128], index: 2, kind: input, shape index: {}]   ;;  %s776_s3 = inlined_call_operand.vmem [shape: f32[1,128], index: 3, kind: input, shape index: {}]   ;;  %s777_s4 = inlined_call_operand.vmem [shape: bf16[128,128], index: 4, kind: output, shape index: {}]  }
   0x1   :  { %v568_v0 = vld [vmem:[%s773_s1 + $0x38] sm:$0xff]  ;;  %v567_v1 = vld [vmem:[%s773_s1 + $0x30] sm:$0xff]  ;;  %v566_v2 = vld [vmem:[%s773_s1 + $0x28] sm:$0xff] }
   0x2   :  { %186 = vmatpush.bf16.msra.mxu0 %v568_v0  ;;  %632 = vmatpush.bf16.msra.mxu2 %v568_v0  ;;  %v565_v3 = vld [vmem:[%s773_s1 + $0x20] sm:$0xff]  ;;  %v564_v4 = vld [vmem:[%s773_s1 + $0x18] sm:$0xff]  ;;  %v563_v5 = vld [vmem:[%s773_s1 + $0x10] sm:$0xff] }
   0x3   :  { %v562_v6 = vld [vmem:[%s773_s1 + $0x8] sm:$0xff]  ;;  %v561_v7 = vld [vmem:[%s773_s1] sm:$0xff]  ;;  %v584_v12 = vld [vmem:[%s775_s2 + $0x38] sm:$0xff] }
   0x4   :  { %v569_v8 = vld [vmem:[%s774_s0] sm:$0xff]  ;;  %v570_v10 = vld [vmem:[%s774_s0 + $0x8] sm:$0xff]  ;;  %362 = vmatpush.bf16.msra.mxu1 %v584_v12  ;;  %v583_v13 = vld [vmem:[%s775_s2 + $0x30] sm:$0xff]  ;;  %640 = vmatpush.bf16.msra.mxu3 %v584_v12 }
   0x5   :  { %v573_v9 = vld [vmem:[%s774_s0 + $0x20] sm:$0xff]  ;;  %v574_v11 = vld [vmem:[%s774_s0 + $0x28] sm:$0xff]  ;;  %v571_v16 = vld [vmem:[%s774_s0 + $0x10] sm:$0xff] }
   0x6   :  { %187 = vmatpush.bf16.msra.mxu0 %v567_v1  ;;  %633 = vmatpush.bf16.msra.mxu2 %v567_v1  ;;  %v582_v14 = vld [vmem:[%s775_s2 + $0x28] sm:$0xff]  ;;  %v581_v15 = vld [vmem:[%s775_s2 + $0x20] sm:$0xff]  ;;  %v575_v17 = vld [vmem:[%s774_s0 + $0x30] sm:$0xff] }
   0x7   :  { %v580_v18 = vld [vmem:[%s775_s2 + $0x18] sm:$0xff]  ;;  %v579_v21 = vld [vmem:[%s775_s2 + $0x10] sm:$0xff]  ;;  %v578_v22 = vld [vmem:[%s775_s2 + $0x8] sm:$0xff] }
   0x8   :  { %363 = vmatpush.bf16.msra.mxu1 %v583_v13  ;;  %641 = vmatpush.bf16.msra.mxu3 %v583_v13  ;;  %v572_v19 = vld [vmem:[%s774_s0 + $0x18] sm:$0xff]  ;;  %v577_v23 = vld [vmem:[%s775_s2] sm:$0xff] }
   0x9   :  { %v576_v20 = vld [vmem:[%s774_s0 + $0x38] sm:$0xff]  ;;  %v648_v49 = vld [vmem:[%s776_s3] ss:$0 sm:$0xff] }
   0xa   :  { %188 = vmatpush.bf16.msra.mxu0 %v566_v2  ;;  %634 = vmatpush.bf16.msra.mxu2 %v566_v2 }
   0xc   :  { %364 = vmatpush.bf16.msra.mxu1 %v582_v14  ;;  %642 = vmatpush.bf16.msra.mxu3 %v582_v14 }
   0xe   :  { %189 = vmatpush.bf16.msra.mxu0 %v565_v3  ;;  %635 = vmatpush.bf16.msra.mxu2 %v565_v3 }
  0x10   :  { %365 = vmatpush.bf16.msra.mxu1 %v581_v15  ;;  %643 = vmatpush.bf16.msra.mxu3 %v581_v15 }
  0x12   :  { %190 = vmatpush.bf16.msra.mxu0 %v564_v4  ;;  %636 = vmatpush.bf16.msra.mxu2 %v564_v4 }
  0x14   :  { %366 = vmatpush.bf16.msra.mxu1 %v580_v18  ;;  %644 = vmatpush.bf16.msra.mxu3 %v580_v18 }
  0x16   :  { %191 = vmatpush.bf16.msra.mxu0 %v563_v5  ;;  %637 = vmatpush.bf16.msra.mxu2 %v563_v5 }
  0x18   :  { %367 = vmatpush.bf16.msra.mxu1 %v579_v21  ;;  %645 = vmatpush.bf16.msra.mxu3 %v579_v21 }
  0x1a   :  { %192 = vmatpush.bf16.msra.mxu0 %v562_v6  ;;  %638 = vmatpush.bf16.msra.mxu2 %v562_v6 }
  0x1c   :  { %368 = vmatpush.bf16.msra.mxu1 %v578_v22  ;;  %646 = vmatpush.bf16.msra.mxu3 %v578_v22 }
  0x1e   :  { %193 = vmatpush.bf16.msra.mxu0 %v561_v7  ;;  %639 = vmatpush.bf16.msra.mxu2 %v561_v7 }
  0x20   :  { %369 = vmatpush.bf16.msra.mxu1 %v577_v23  ;;  %647 = vmatpush.bf16.msra.mxu3 %v577_v23 }
  0x21   :  { %194 = vmatmul.bf16.vlgmr.msra.gmra.mxu0 %v569_v8  ;;  %214 = vmatmul.bf16.vlgmr.msra.gmra.mxu2 %v573_v9 }
  0x31   :  { %199 = vmatmul.bf16.gmra.mxu0 %v570_v10  ;;  %219 = vmatmul.bf16.gmra.mxu2 %v574_v11 }
  0x41   :  { %204 = vmatmul.bf16.gmra.mxu0 %v571_v16  ;;  %224 = vmatmul.bf16.gmra.mxu2 %v575_v17 }
  0x51   :  { %209 = vmatmul.bf16.gmra.mxu0 %v572_v19  ;;  %229 = vmatmul.bf16.gmra.mxu2 %v576_v20 }
  0x9e   :  { %v195_v24 = vpop.f32.mrf.mxu0 }
  0xa4   :  { %v215_v25 = vpop.f32.mrf.mxu2 }
  0xa6   :  { %v197_v26 = vpop.f32.mrf.mxu0 }
  0xa7   :  { %v286_v27 = vpack.c.bf16 %v197_v26, %v195_v24 }
  0xa9   :  { %370 = vmatmul.bf16.vlgmr.msra.gmra.mxu1 %v286_v27 }
  0xac   :  { %v217_v28 = vpop.f32.mrf.mxu2 }
  0xad   :  { %v290_v29 = vpack.c.bf16 %v217_v28, %v215_v25 }
  0xae   :  { %v200_v30 = vpop.f32.mrf.mxu0 }
  0xaf   :  { %390 = vmatmul.bf16.vlgmr.msra.gmra.mxu3 %v290_v29 }
  0xb4   :  { %v220_v31 = vpop.f32.mrf.mxu2 }
  0xb6   :  { %v202_v32 = vpop.f32.mrf.mxu0 }
  0xb7   :  { %v287_v33 = vpack.c.bf16 %v202_v32, %v200_v30 }
  0xb9   :  { %375 = vmatmul.bf16.gmra.mxu1 %v287_v33 }
  0xbc   :  { %v222_v34 = vpop.f32.mrf.mxu2 }
  0xbd   :  { %v291_v35 = vpack.c.bf16 %v222_v34, %v220_v31 }
  0xbe   :  { %v205_v36 = vpop.f32.mrf.mxu0 }
  0xbf   :  { %395 = vmatmul.bf16.gmra.mxu3 %v291_v35 }
  0xc4   :  { %v225_v37 = vpop.f32.mrf.mxu2 }
  0xc6   :  { %v207_v38 = vpop.f32.mrf.mxu0 }
  0xc7   :  { %v288_v39 = vpack.c.bf16 %v207_v38, %v205_v36 }
  0xc9   :  { %380 = vmatmul.bf16.gmra.mxu1 %v288_v39 }
  0xcc   :  { %v227_v40 = vpop.f32.mrf.mxu2 }
  0xcd   :  { %v292_v41 = vpack.c.bf16 %v227_v40, %v225_v37 }
  0xce   :  { %v210_v42 = vpop.f32.mrf.mxu0 }
  0xcf   :  { %400 = vmatmul.bf16.gmra.mxu3 %v292_v41 }
  0xd4   :  { %v230_v43 = vpop.f32.mrf.mxu2 }
  0xd6   :  { %v212_v44 = vpop.f32.mrf.mxu0 }
  0xd7   :  { %v289_v45 = vpack.c.bf16 %v212_v44, %v210_v42 }
  0xd9   :  { %385 = vmatmul.bf16.gmra.mxu1 %v289_v45 }
  0xdc   :  { %v232_v46 = vpop.f32.mrf.mxu2 }
  0xdd   :  { %v293_v47 = vpack.c.bf16 %v232_v46, %v230_v43 }
  0xdf   :  { %405 = vmatmul.bf16.gmra.mxu3 %v293_v47 }
 0x126   :  { %v371_v48 = vpop.f32.mrf.mxu1 }
 0x127   :  { %v372_v50 = vadd.f32 %v648_v49, %v371_v48 }
 0x129   :  { %v411_v53 = vmax.f32 %v372_v50, 0.0 }
 0x12e   :  { %v373_v51 = vpop.f32.mrf.mxu1 }
 0x12f   :  { %v374_v52 = vadd.f32 %v648_v49, %v373_v51 }
 0x131   :  { %v412_v54 = vmax.f32 %v374_v52, 0.0 }
 0x132   :  { %v391_v55 = vpop.f32.mrf.mxu3 }
 0x133   :  { %v588_v56 = vpack.c.bf16 %v412_v54, %v411_v53  ;;  %v392_v58 = vadd.f32 %v648_v49, %v391_v55 }
 0x135   :  { %589 = vst [vmem:[%s777_s4] sm:$0xff] %v588_v56   ;;  %v419_v61 = vmax.f32 %v392_v58, 0.0 }
 0x136   :  { %v376_v57 = vpop.f32.mrf.mxu1 }
 0x137   :  { %v377_v62 = vadd.f32 %v648_v49, %v376_v57 }
 0x139   :  { %v413_v3 = vmax.f32 %v377_v62, 0.0 }
 0x13a   :  { %v393_v59 = vpop.f32.mrf.mxu3 }
 0x13b   :  { %v394_v60 = vadd.f32 %v648_v49, %v393_v59 }
 0x13d   :  { %v420_v63 = vmax.f32 %v394_v60, 0.0 }
 0x13e   :  { %v378_v0 = vpop.f32.mrf.mxu1 }
 0x13f   :  { %v608_v1 = vpack.c.bf16 %v420_v63, %v419_v61  ;;  %v379_v2 = vadd.f32 %v648_v49, %v378_v0 }
 0x141   :  { %628 = vst [vmem:[%s777_s4 + $0x20] sm:$0xff] %v608_v1   ;;  %v414_v4 = vmax.f32 %v379_v2, 0.0 }
 0x142   :  { %v396_v5 = vpop.f32.mrf.mxu3 }
 0x143   :  { %v593_v6 = vpack.c.bf16 %v414_v4, %v413_v3  ;;  %v397_v8 = vadd.f32 %v648_v49, %v396_v5 }
 0x145   :  { %625 = vst [vmem:[%s777_s4 + $0x8] sm:$0xff] %v593_v6   ;;  %v421_v11 = vmax.f32 %v397_v8, 0.0 }
 0x146   :  { %v381_v7 = vpop.f32.mrf.mxu1 }
 0x147   :  { %v382_v12 = vadd.f32 %v648_v49, %v381_v7 }
 0x149   :  { %v415_v17 = vmax.f32 %v382_v12, 0.0 }
 0x14a   :  { %v398_v9 = vpop.f32.mrf.mxu3 }
 0x14b   :  { %v399_v10 = vadd.f32 %v648_v49, %v398_v9 }
 0x14d   :  { %v422_v13 = vmax.f32 %v399_v10, 0.0 }
 0x14e   :  { %v383_v14 = vpop.f32.mrf.mxu1 }
 0x14f   :  { %v613_v15 = vpack.c.bf16 %v422_v13, %v421_v11  ;;  %v384_v16 = vadd.f32 %v648_v49, %v383_v14 }
 0x151   :  { %629 = vst [vmem:[%s777_s4 + $0x28] sm:$0xff] %v613_v15   ;;  %v416_v18 = vmax.f32 %v384_v16, 0.0 }
 0x152   :  { %v401_v19 = vpop.f32.mrf.mxu3 }
 0x153   :  { %v598_v20 = vpack.c.bf16 %v416_v18, %v415_v17  ;;  %v402_v22 = vadd.f32 %v648_v49, %v401_v19 }
 0x155   :  { %626 = vst [vmem:[%s777_s4 + $0x10] sm:$0xff] %v598_v20   ;;  %v423_v25 = vmax.f32 %v402_v22, 0.0 }
 0x156   :  { %v386_v21 = vpop.f32.mrf.mxu1 }
 0x157   :  { %v387_v26 = vadd.f32 %v648_v49, %v386_v21 }
 0x159   :  { %v417_v31 = vmax.f32 %v387_v26, 0.0 }
 0x15a   :  { %v403_v23 = vpop.f32.mrf.mxu3 }
 0x15b   :  { %v404_v24 = vadd.f32 %v648_v49, %v403_v23 }
 0x15d   :  { %v424_v27 = vmax.f32 %v404_v24, 0.0 }
 0x15e   :  { %v388_v28 = vpop.f32.mrf.mxu1 }
 0x15f   :  { %v618_v29 = vpack.c.bf16 %v424_v27, %v423_v25  ;;  %v389_v30 = vadd.f32 %v648_v49, %v388_v28 }
 0x161   :  { %630 = vst [vmem:[%s777_s4 + $0x30] sm:$0xff] %v618_v29   ;;  %v418_v32 = vmax.f32 %v389_v30, 0.0 }
 0x162   :  { %v406_v33 = vpop.f32.mrf.mxu3 }
 0x163   :  { %v603_v34 = vpack.c.bf16 %v418_v32, %v417_v31  ;;  %v407_v35 = vadd.f32 %v648_v49, %v406_v33 }
 0x165   :  { %627 = vst [vmem:[%s777_s4 + $0x18] sm:$0xff] %v603_v34   ;;  %v425_v38 = vmax.f32 %v407_v35, 0.0 }
 0x16a   :  { %v408_v36 = vpop.f32.mrf.mxu3 }
 0x16b   :  { %v409_v37 = vadd.f32 %v648_v49, %v408_v36 }
 0x16d   :  { %v426_v39 = vmax.f32 %v409_v37, 0.0 }
 0x16f   :  { %v623_v40 = vpack.c.bf16 %v426_v39, %v425_v38 }
 0x171   :  { %631 = vst [vmem:[%s777_s4 + $0x38] sm:$0xff] %v623_v40  }

// kernel: gcn_forward.3
= control target key start
LH: loop header
LB: loop body
LE: loop exit
PB: predicated region body
PF: predicated region fallthrough
CT: control target
= control target key end

     0   :  { %s890_s1 = inlined_call_operand.vmem [shape: bf16[128,128], index: 1, kind: input, shape index: {}]   ;;  %s891_s0 = inlined_call_operand.vmem [shape: bf16[128,128], index: 0, kind: input, shape index: {}]   ;;  %s892_s2 = inlined_call_operand.vmem [shape: bf16[128,128], index: 2, kind: input, shape index: {}]   ;;  %s893_s3 = inlined_call_operand.vmem [shape: f32[1,128], index: 3, kind: input, shape index: {}]   ;;  %s894_s5 = inlined_call_operand.vmem [shape: bf16[128,128], index: 5, kind: input, shape index: {}]   ;;  %s895_s4 = inlined_call_operand.vmem [shape: f32[8,128], index: 4, kind: input, shape index: {}]   ;;  %s896_s6 = inlined_call_operand.vmem [shape: f32[1,128], index: 6, kind: input, shape index: {}]   ;;  %s897_s7 = inlined_call_operand.vmem [shape: f32[8,128], index: 7, kind: output, shape index: {}]  }
   0x1   :  { %v693_v0 = vld [vmem:[%s890_s1 + $0x38] sm:$0xff]  ;;  %v692_v1 = vld [vmem:[%s890_s1 + $0x30] sm:$0xff]  ;;  %v691_v2 = vld [vmem:[%s890_s1 + $0x28] sm:$0xff] }
   0x2   :  { %201 = vmatpush.bf16.msra.mxu0 %v693_v0  ;;  %718 = vmatpush.bf16.msra.mxu2 %v693_v0  ;;  %v690_v3 = vld [vmem:[%s890_s1 + $0x20] sm:$0xff]  ;;  %v689_v4 = vld [vmem:[%s890_s1 + $0x18] sm:$0xff]  ;;  %v688_v5 = vld [vmem:[%s890_s1 + $0x10] sm:$0xff] }
   0x3   :  { %v687_v6 = vld [vmem:[%s890_s1 + $0x8] sm:$0xff]  ;;  %v686_v7 = vld [vmem:[%s890_s1] sm:$0xff]  ;;  %v700_v11 = vld [vmem:[%s891_s0 + $0x30] sm:$0xff] }
   0x4   :  { %v694_v8 = vld [vmem:[%s891_s0] sm:$0xff]  ;;  %v699_v9 = vld [vmem:[%s891_s0 + $0x28] sm:$0xff]  ;;  %v696_v12 = vld [vmem:[%s891_s0 + $0x10] sm:$0xff] }
   0x5   :  { %v695_v10 = vld [vmem:[%s891_s0 + $0x8] sm:$0xff]  ;;  %v701_v13 = vld [vmem:[%s891_s0 + $0x38] sm:$0xff]  ;;  %v708_v15 = vld [vmem:[%s892_s2 + $0x30] sm:$0xff] }
   0x6   :  { %202 = vmatpush.bf16.msra.mxu0 %v692_v1  ;;  %719 = vmatpush.bf16.msra.mxu2 %v692_v1  ;;  %v709_v14 = vld [vmem:[%s892_s2 + $0x38] sm:$0xff]  ;;  %v707_v16 = vld [vmem:[%s892_s2 + $0x28] sm:$0xff]  ;;  %v706_v17 = vld [vmem:[%s892_s2 + $0x20] sm:$0xff] }
   0x7   :  { %377 = vmatpush.bf16.msra.mxu1 %v709_v14  ;;  %726 = vmatpush.bf16.msra.mxu3 %v709_v14  ;;  %v697_v18 = vld [vmem:[%s891_s0 + $0x18] sm:$0xff]  ;;  %v698_v20 = vld [vmem:[%s891_s0 + $0x20] sm:$0xff]  ;;  %v704_v21 = vld [vmem:[%s892_s2 + $0x10] sm:$0xff] }
   0x8   :  { %v705_v19 = vld [vmem:[%s892_s2 + $0x18] sm:$0xff]  ;;  %v703_v22 = vld [vmem:[%s892_s2 + $0x8] sm:$0xff]  ;;  %v702_v23 = vld [vmem:[%s892_s2] sm:$0xff] }
   0x9   :  { %v734_v60 = vld [vmem:[%s893_s3] ss:$0 sm:$0xff]  ;;  %v715_v14 = vld [vmem:[%s894_s5 + $0x28] sm:$0xff] }
   0xa   :  { %203 = vmatpush.bf16.msra.mxu0 %v691_v2  ;;  %720 = vmatpush.bf16.msra.mxu2 %v691_v2 }
   0xb   :  { %378 = vmatpush.bf16.msra.mxu1 %v708_v15  ;;  %727 = vmatpush.bf16.msra.mxu3 %v708_v15 }
   0xe   :  { %204 = vmatpush.bf16.msra.mxu0 %v690_v3  ;;  %721 = vmatpush.bf16.msra.mxu2 %v690_v3 }
   0xf   :  { %379 = vmatpush.bf16.msra.mxu1 %v707_v16  ;;  %728 = vmatpush.bf16.msra.mxu3 %v707_v16 }
  0x12   :  { %205 = vmatpush.bf16.msra.mxu0 %v689_v4  ;;  %722 = vmatpush.bf16.msra.mxu2 %v689_v4 }
  0x13   :  { %380 = vmatpush.bf16.msra.mxu1 %v706_v17  ;;  %729 = vmatpush.bf16.msra.mxu3 %v706_v17 }
  0x16   :  { %206 = vmatpush.bf16.msra.mxu0 %v688_v5  ;;  %723 = vmatpush.bf16.msra.mxu2 %v688_v5 }
  0x17   :  { %381 = vmatpush.bf16.msra.mxu1 %v705_v19  ;;  %730 = vmatpush.bf16.msra.mxu3 %v705_v19 }
  0x1a   :  { %207 = vmatpush.bf16.msra.mxu0 %v687_v6  ;;  %724 = vmatpush.bf16.msra.mxu2 %v687_v6 }
  0x1b   :  { %382 = vmatpush.bf16.msra.mxu1 %v704_v21  ;;  %731 = vmatpush.bf16.msra.mxu3 %v704_v21 }
  0x1e   :  { %208 = vmatpush.bf16.msra.mxu0 %v686_v7  ;;  %725 = vmatpush.bf16.msra.mxu2 %v686_v7 }
  0x1f   :  { %383 = vmatpush.bf16.msra.mxu1 %v703_v22  ;;  %732 = vmatpush.bf16.msra.mxu3 %v703_v22 }
  0x21   :  { %209 = vmatmul.bf16.vlgmr.msra.gmra.mxu0 %v694_v8  ;;  %234 = vmatmul.bf16.vlgmr.msra.gmra.mxu2 %v699_v9 }
  0x23   :  { %384 = vmatpush.bf16.msra.mxu1 %v702_v23  ;;  %733 = vmatpush.bf16.msra.mxu3 %v702_v23  ;;  %v713_v23 = vld [vmem:[%s894_s5 + $0x18] sm:$0xff] }
  0x31   :  { %214 = vmatmul.bf16.gmra.mxu0 %v695_v10  ;;  %239 = vmatmul.bf16.gmra.mxu2 %v700_v11  ;;  %v717_v11 = vld [vmem:[%s894_s5 + $0x38] sm:$0xff] }
  0x32   :  { %538 = vmatpush.bf16.msrb.mxu3 %v717_v11 }
  0x41   :  { %219 = vmatmul.bf16.gmra.mxu0 %v696_v12  ;;  %244 = vmatmul.bf16.gmra.mxu2 %v701_v13  ;;  %v716_v13 = vld [vmem:[%s894_s5 + $0x30] sm:$0xff] }
  0x42   :  { %539 = vmatpush.bf16.msrb.mxu3 %v716_v13 }
  0x46   :  { %540 = vmatpush.bf16.msrb.mxu3 %v715_v14 }
  0x51   :  { %224 = vmatmul.bf16.gmra.mxu0 %v697_v18  ;;  %v714_v18 = vld [vmem:[%s894_s5 + $0x20] sm:$0xff] }
  0x52   :  { %541 = vmatpush.bf16.msrb.mxu3 %v714_v18 }
  0x56   :  { %542 = vmatpush.bf16.msrb.mxu3 %v713_v23 }
  0x61   :  { %229 = vmatmul.bf16.gmra.mxu0 %v698_v20 }
  0x9e   :  { %v210_v24 = vpop.f32.mrf.mxu0 }
  0xa4   :  { %v235_v25 = vpop.f32.mrf.mxu2 }
  0xa6   :  { %v212_v26 = vpop.f32.mrf.mxu0 }
  0xa7   :  { %v301_v27 = vpack.c.bf16 %v212_v26, %v210_v24 }
  0xa9   :  { %385 = vmatmul.bf16.vlgmr.msra.gmra.mxu1 %v301_v27 }
  0xac   :  { %v237_v28 = vpop.f32.mrf.mxu2 }
  0xad   :  { %v306_v29 = vpack.c.bf16 %v237_v28, %v235_v25  ;;  %v712_v28 = vld [vmem:[%s894_s5 + $0x10] sm:$0xff] }
  0xae   :  { %v215_v30 = vpop.f32.mrf.mxu0  ;;  %543 = vmatpush.bf16.msrb.mxu3 %v712_v28 }
  0xaf   :  { %410 = vmatmul.bf16.vlgmr.msra.gmra.mxu3 %v306_v29 }
  0xb4   :  { %v240_v31 = vpop.f32.mrf.mxu2 }
  0xb6   :  { %v217_v32 = vpop.f32.mrf.mxu0 }
  0xb7   :  { %v302_v33 = vpack.c.bf16 %v217_v32, %v215_v30 }
  0xb9   :  { %390 = vmatmul.bf16.gmra.mxu1 %v302_v33  ;;  %v711_v33 = vld [vmem:[%s894_s5 + $0x8] sm:$0xff] }
  0xba   :  { %544 = vmatpush.bf16.msrb.mxu3 %v711_v33 }
  0xbc   :  { %v242_v34 = vpop.f32.mrf.mxu2 }
  0xbd   :  { %v307_v35 = vpack.c.bf16 %v242_v34, %v240_v31 }
  0xbe   :  { %v220_v36 = vpop.f32.mrf.mxu0 }
  0xbf   :  { %415 = vmatmul.bf16.gmra.mxu3 %v307_v35 }
  0xc4   :  { %v245_v37 = vpop.f32.mrf.mxu2 }
  0xc6   :  { %v222_v38 = vpop.f32.mrf.mxu0 }
  0xc7   :  { %v303_v39 = vpack.c.bf16 %v222_v38, %v220_v36 }
  0xc9   :  { %395 = vmatmul.bf16.gmra.mxu1 %v303_v39 }
  0xcc   :  { %v247_v40 = vpop.f32.mrf.mxu2 }
  0xcd   :  { %v308_v41 = vpack.c.bf16 %v247_v40, %v245_v37  ;;  %v443_v40 = vld [vmem:[%s895_s4] sm:$0xff] }
  0xce   :  { %v225_v42 = vpop.f32.mrf.mxu0 }
  0xcf   :  { %420 = vmatmul.bf16.gmra.mxu3 %v308_v41  ;;  %v710_v41 = vld [vmem:[%s894_s5] sm:$0xff] }
  0xd0   :  { %545 = vmatpush.bf16.msrb.mxu3 %v710_v41 }
  0xd6   :  { %v227_v43 = vpop.f32.mrf.mxu0 }
  0xd7   :  { %v304_v44 = vpack.c.bf16 %v227_v43, %v225_v42 }
  0xd9   :  { %400 = vmatmul.bf16.gmra.mxu1 %v304_v44  ;;  %v735_v44 = vld [vmem:[%s896_s6] ss:$0 sm:$0xff] }
  0xde   :  { %v230_v45 = vpop.f32.mrf.mxu0 }
  0xe6   :  { %v232_v46 = vpop.f32.mrf.mxu0 }
  0xe7   :  { %v305_v47 = vpack.c.bf16 %v232_v46, %v230_v45 }
  0xe9   :  { %405 = vmatmul.bf16.gmra.mxu1 %v305_v47 }
 0x126   :  { %v848_v48 = vpop.f32.mrf.mxu1 }
 0x127   :  { %v387_v36 = vadd.f32 %v734_v60, %v848_v48 }
 0x129   :  { %v426_v39 = vmax.f32 %v387_v36, 0.0 }
 0x12e   :  { %v850_v49 = vpop.f32.mrf.mxu1 }
 0x12f   :  { %v389_v34 = vadd.f32 %v734_v60, %v850_v49 }
 0x131   :  { %v427_v38 = vmax.f32 %v389_v34, 0.0 }
 0x132   :  { %v411_v50 = vpop.f32.mrf.mxu3 }
 0x133   :  { %v412_v7 = vadd.f32 %v734_v60, %v411_v50 }
 0x135   :  { %v436_v12 = vmax.f32 %v412_v7, 0.0 }
 0x136   :  { %v391_v51 = vpop.f32.mrf.mxu1 }
 0x137   :  { %v392_v31 = vadd.f32 %v734_v60, %v391_v51 }
 0x139   :  { %v428_v37 = vmax.f32 %v392_v31, 0.0 }
 0x13a   :  { %v413_v52 = vpop.f32.mrf.mxu3 }
 0x13b   :  { %v414_v5 = vadd.f32 %v734_v60, %v413_v52 }
 0x13d   :  { %v437_v9 = vmax.f32 %v414_v5, 0.0 }
 0x13e   :  { %v393_v53 = vpop.f32.mrf.mxu1 }
 0x13f   :  { %v394_v29 = vadd.f32 %v734_v60, %v393_v53 }
 0x141   :  { %v429_v35 = vmax.f32 %v394_v29, 0.0 }
 0x142   :  { %v416_v54 = vpop.f32.mrf.mxu3 }
 0x143   :  { %v417_v3 = vadd.f32 %v734_v60, %v416_v54 }
 0x145   :  { %v438_v8 = vmax.f32 %v417_v3, 0.0 }
 0x146   :  { %v396_v55 = vpop.f32.mrf.mxu1 }
 0x147   :  { %v397_v26 = vadd.f32 %v734_v60, %v396_v55 }
 0x149   :  { %v430_v32 = vmax.f32 %v397_v26, 0.0 }
 0x14a   :  { %v418_v56 = vpop.f32.mrf.mxu3 }
 0x14b   :  { %v419_v0 = vadd.f32 %v734_v60, %v418_v56 }
 0x14d   :  { %v439_v6 = vmax.f32 %v419_v0, 0.0 }
 0x14e   :  { %v398_v57 = vpop.f32.mrf.mxu1 }
 0x14f   :  { %v399_v24 = vadd.f32 %v734_v60, %v398_v57 }
 0x151   :  { %v431_v30 = vmax.f32 %v399_v24, 0.0 }
 0x152   :  { %v421_v58 = vpop.f32.mrf.mxu3 }
 0x153   :  { %v422_v62 = vadd.f32 %v734_v60, %v421_v58 }
 0x155   :  { %v440_v4 = vmax.f32 %v422_v62, 0.0 }
 0x156   :  { %v401_v59 = vpop.f32.mrf.mxu1 }
 0x157   :  { %v402_v21 = vadd.f32 %v734_v60, %v401_v59 }
 0x159   :  { %v432_v27 = vmax.f32 %v402_v21, 0.0 }
 0x15a   :  { %v423_v61 = vpop.f32.mrf.mxu3 }
 0x15b   :  { %v424_v63 = vadd.f32 %v734_v60, %v423_v61 }
 0x15d   :  { %v441_v1 = vmax.f32 %v424_v63, 0.0 }
 0x15e   :  { %v403_v2 = vpop.f32.mrf.mxu1 }
 0x15f   :  { %444 = vmatpush.msrb.mxu2 %v441_v1  ;;  %v404_v19 = vadd.f32 %v734_v60, %v403_v2 }
 0x161   :  { %445 = vmatpush.msrb.mxu2 %v440_v4  ;;  %v433_v25 = vmax.f32 %v404_v19, 0.0 }
 0x163   :  { %446 = vmatpush.msrb.mxu2 %v439_v6 }
 0x165   :  { %447 = vmatpush.msrb.mxu2 %v438_v8 }
 0x166   :  { %v406_v10 = vpop.f32.mrf.mxu1 }
 0x167   :  { %448 = vmatpush.msrb.mxu2 %v437_v9  ;;  %v407_v16 = vadd.f32 %v734_v60, %v406_v10 }
 0x169   :  { %449 = vmatpush.msrb.mxu2 %v436_v12  ;;  %v434_v22 = vmax.f32 %v407_v16, 0.0 }
 0x16e   :  { %v408_v15 = vpop.f32.mrf.mxu1 }
 0x16f   :  { %v409_v17 = vadd.f32 %v734_v60, %v408_v15 }
 0x171   :  { %v435_v20 = vmax.f32 %v409_v17, 0.0 }
 0x173   :  { %450 = vmatpush.msrb.mxu2 %v435_v20 }
 0x175   :  { %451 = vmatpush.msrb.mxu2 %v434_v22 }
 0x177   :  { %452 = vmatpush.msrb.mxu2 %v433_v25 }
 0x179   :  { %453 = vmatpush.msrb.mxu2 %v432_v27 }
 0x17b   :  { %454 = vmatpush.msrb.mxu2 %v431_v30 }
 0x17d   :  { %455 = vmatpush.msrb.mxu2 %v430_v32 }
 0x17f   :  { %456 = vmatpush.msrb.mxu2 %v429_v35 }
 0x181   :  { %457 = vmatpush.msrb.mxu2 %v428_v37 }
 0x183   :  { %458 = vmatpush.msrb.mxu2 %v427_v38 }
 0x185   :  { %459 = vmatpush.msrb.mxu2 %v426_v39 }
 0x186   :  { %460 = vmatmul.f32.vlgmr.msrb.gmra.mxu2 %v443_v40 }
 0x209   :  { %v461_v42 = vpop.f32.mrf.mxu2 }
 0x20a   :  { %v469_v43 = vpack.c.bf16 %v461_v42, %v461_v42 }
 0x20c   :  { %546 = vmatmul.bf16.vlgmr.msrb.gmra.mxu3 %v469_v43 }
 0x28f   :  { %v547_v45 = vpop.f32.mrf.mxu3 }
 0x290   :  { %v548_v46 = vadd.f32 %v735_v44, %v547_v45 }
 0x292   :  { %551 = vst [vmem:[%s897_s7] sm:$0xff] %v548_v46 }
 0x297   :  { %v549_v47 = vpop.f32.mrf.mxu3 }

</bundles_post_ra>
